<compile_context>
chip_gen: v6e
topology: v6e:2x2x1
jax: 0.10.0
libtpu: 0.0.40
codegen_flags: <defaults>
</compile_context>

<pallas_src>
import jax
import jax.numpy as jnp
from jax.experimental import pallas as pl
from jax.experimental.pallas import tpu as pltpu

_K = 784        # flattened 28*28 input features
_N_OUT = 10     # output features of nn.Linear(784, 10)


def _linear_kernel(x_ref, w_ref, b_ref, o_ref):
    # x_ref: [TB, K], w_ref: [K, N], b_ref: [1, N], o_ref: [TB, N]
    acc = jnp.dot(x_ref[...], w_ref[...], preferred_element_type=jnp.float32)
    o_ref[...] = (acc + b_ref[...].astype(jnp.float32)).astype(o_ref.dtype)


def _choose_tb(B, tb):
    """Pick a legal batch tile: multiple of 8 (or == B), and split into >=2
    grid steps when possible so the 'parallel' axis can use both v7x cores."""
    tb = max(8, (tb // 8) * 8)           # defensive: sublane-legal tile
    if B > tb:
        return tb
    if B % 8 == 0 and B >= 16:
        half = ((B + 1) // 2 + 7) // 8 * 8
        if half < B:
            return half                  # >=2 grid steps, still a multiple of 8
    return B                             # single full-extent block (always legal)


def net_forward(x, w, b, *, tb=2048, force_pallas=False):
    """Net.forward: x [B, 1, 28, 28] -> fc(x.view(B, -1)) -> [B, 10].

    w: [784, 10] (transposed vs PyTorch's [10, 784]), b: [10].
    tb: requested batch tile (rows per grid step); rounded down to a multiple
        of 8. 2048 keeps the double-buffered footprint ~13 MiB (safe on every
        TPU generation); raise toward 4096-8192 on v5e/v6e if desired.
    """
    B = x.shape[0]
    x_flat = x.reshape(B, -1)                      # the .view() — free in JAX

    # For tiny batches the launch + per-step overhead dominates a ~16 KFLOP
    # matmul; XLA's fused dot is as fast or faster.
    if B < 256 and not force_pallas:
        return x_flat @ w + b

    b2d = b.reshape(1, _N_OUT)
    TB = _choose_tb(B, tb)
    grid = (pl.cdiv(B, TB),)

    itemsize = jnp.dtype(x.dtype).itemsize
    out_itemsize = itemsize
    footprint = (2 * TB * _K * itemsize            # double-buffered activation tiles
                 + 2 * TB * _N_OUT * out_itemsize  # double-buffered output tiles
                 + _K * _N_OUT * jnp.dtype(w.dtype).itemsize
                 + _N_OUT * jnp.dtype(b.dtype).itemsize)
    vmem_limit = int(min(max(footprint + (4 << 20), 16 << 20), 96 << 20))

    bytes_accessed = (B * _K * itemsize            # activations (dominant stream)
                      + _K * _N_OUT * jnp.dtype(w.dtype).itemsize
                      + _N_OUT * jnp.dtype(b.dtype).itemsize
                      + B * _N_OUT * out_itemsize)

    out = pl.pallas_call(
        _linear_kernel,
        out_shape=jax.ShapeDtypeStruct((B, _N_OUT), x.dtype),
        grid=grid,
        in_specs=[
            pl.BlockSpec((TB, _K), lambda i: (i, 0)),       # batch-tiled activations
            pl.BlockSpec((_K, _N_OUT), lambda i: (0, 0)),   # resident weights
            pl.BlockSpec((1, _N_OUT), lambda i: (0, 0)),    # resident bias
        ],
        out_specs=pl.BlockSpec((TB, _N_OUT), lambda i: (i, 0)),
        compiler_params=pltpu.CompilerParams(
            dimension_semantics=("parallel",),   # shard batch tiles across TCs (v7x)
            vmem_limit_bytes=vmem_limit,
        ),
        cost_estimate=pl.CostEstimate(
            flops=2 * B * _K * _N_OUT,
            transcendentals=0,
            bytes_accessed=bytes_accessed,
        ),
    )(x_flat, w, b2d)
    return out


if __name__ == "__main__":
    key = jax.random.PRNGKey(0)
    k_x, k_w, k_b, k_x2, k_x3 = jax.random.split(key, 5)

    # Deterministic param init matching nn.Linear's fan-in uniform range.
    bound = 1.0 / (_K ** 0.5)
    w = jax.random.uniform(k_w, (_K, _N_OUT), jnp.float32, minval=-bound, maxval=bound)
    b = jax.random.uniform(k_b, (_N_OUT,), jnp.float32, minval=-bound, maxval=bound)

    # MXU f32 dots may be multi-pass bf16 internally; use a safe tolerance.
    ATOL, RTOL = 2e-4, 1e-4

    # Test 1: small batch (B=2), NCHW [B, 1, 28, 28], forcing the Pallas path.
    B1 = 2
    x1 = jax.random.normal(k_x, (B1, 1, 28, 28), dtype=jnp.float32)
    out1 = net_forward(x1, w, b, force_pallas=True)
    jax.block_until_ready(out1)
    ref1 = x1.reshape(B1, -1) @ w + b
    assert out1.shape == (B1, _N_OUT)
    assert jnp.allclose(out1, ref1, atol=ATOL, rtol=RTOL)

    # Test 2: multi-block grid (B=256, TB=128 -> 2 pipelined / core-parallel steps).
    B2 = 256
    x2 = jax.random.normal(k_x2, (B2, 1, 28, 28), dtype=jnp.float32)
    out2 = net_forward(x2, w, b, tb=128)
    jax.block_until_ready(out2)
    ref2 = x2.reshape(B2, -1) @ w + b
    assert out2.shape == (B2, _N_OUT)
    assert jnp.allclose(out2, ref2, atol=ATOL, rtol=RTOL)

    # Test 3: ragged batch (B=200, TB=128 -> partial last block, masked writeback).
    B3 = 200
    x3 = jax.random.normal(k_x3, (B3, 1, 28, 28), dtype=jnp.float32)
    out3 = net_forward(x3, w, b, tb=128, force_pallas=True)
    jax.block_until_ready(out3)
    ref3 = x3.reshape(B3, -1) @ w + b
    assert out3.shape == (B3, _N_OUT)
    assert jnp.allclose(out3, ref3, atol=ATOL, rtol=RTOL)

    print("KERNEL_OK")
</pallas_src>

<mosaic_0001>
module attributes {stable_mosaic.version = 11 : i64} {
  func.func @_linear_kernel(%arg0: i32, %arg1: memref<2x784xf32, #tpu.memory_space<vmem>>, %arg2: memref<784x10xf32, #tpu.memory_space<vmem>>, %arg3: memref<1x10xf32, #tpu.memory_space<vmem>>, %arg4: memref<2x10xf32, #tpu.memory_space<vmem>>) attributes {dimension_semantics = [#tpu.dimension_semantics<parallel>], iteration_bounds = array<i64: 1>, scalar_prefetch = 0 : i64, scratch_operands = 0 : i64, tpu.core_type = #tpu.core_type<tc>, window_params = [{transform_indices = @transform_0, window_bounds = array<i64: 2, 784>}, {pipeline_mode = #tpu.pipeline_mode<synchronous>, transform_indices = @transform_1, window_bounds = array<i64: 784, 10>}, {pipeline_mode = #tpu.pipeline_mode<synchronous>, transform_indices = @transform_2, window_bounds = array<i64: 1, 10>}, {transform_indices = @transform_3, window_bounds = array<i64: 2, 10>}]} {
    %c0 = arith.constant 0 : index
    %c0_0 = arith.constant 0 : index
    %0 = vector.load %arg1[%c0, %c0_0] : memref<2x784xf32, #tpu.memory_space<vmem>>, vector<2x784xf32>
    %c0_1 = arith.constant 0 : index
    %c0_2 = arith.constant 0 : index
    %1 = vector.load %arg2[%c0_1, %c0_2] : memref<784x10xf32, #tpu.memory_space<vmem>>, vector<784x10xf32>
    %cst = arith.constant dense<0.000000e+00> : vector<2x10xf32>
    %2 = tpu.matmul %0, %1, %cst {dimension_numbers = #tpu.dot_dimension_numbers<[1], [0], [0], [1], [0, 0, 1, 1], [], []>} : vector<2x784xf32>, vector<784x10xf32>, vector<2x10xf32> -> vector<2x10xf32>
    %c0_3 = arith.constant 0 : index
    %c0_4 = arith.constant 0 : index
    %3 = vector.load %arg3[%c0_3, %c0_4] : memref<1x10xf32, #tpu.memory_space<vmem>>, vector<1x10xf32>
    %4 = vector.broadcast %3 : vector<1x10xf32> to vector<2x10xf32>
    %5 = arith.addf %2, %4 : vector<2x10xf32>
    %c0_5 = arith.constant 0 : index
    %c0_6 = arith.constant 0 : index
    %6 = vector.load %arg4[%c0_5, %c0_6] : memref<2x10xf32, #tpu.memory_space<vmem>>, vector<2x10xf32>
    tpu.vector_store %arg4[%c0_5, %c0_6], %5 {strides = array<i32>} : memref<2x10xf32, #tpu.memory_space<vmem>>, vector<2x10xf32>,
    return
  }
  func.func @transform_0(%arg0: i32) -> (i32, i32) {
    %c0_i32 = arith.constant 0 : i32
    %c0_i32_0 = arith.constant 0 : i32
    return %arg0, %c0_i32 : i32, i32
  }
  func.func @transform_1(%arg0: i32) -> (i32, i32) {
    %c0_i32 = arith.constant 0 : i32
    %c0_i32_0 = arith.constant 0 : i32
    %c0_i32_1 = arith.constant 0 : i32
    return %c0_i32, %c0_i32_0 : i32, i32
  }
  func.func @transform_2(%arg0: i32) -> (i32, i32) {
    %c0_i32 = arith.constant 0 : i32
    %c0_i32_0 = arith.constant 0 : i32
    %c0_i32_1 = arith.constant 0 : i32
    return %c0_i32, %c0_i32_0 : i32, i32
  }
  func.func @transform_3(%arg0: i32) -> (i32, i32) {
    %c0_i32 = arith.constant 0 : i32
    %c0_i32_0 = arith.constant 0 : i32
    return %arg0, %c0_i32 : i32, i32
  }
}

</mosaic_0001>

<bundles_post_ra>
// kernel: tpu_custom_call.1
= control target key start
LH: loop header
LB: loop body
LE: loop exit
PB: predicated region body
PF: predicated region fallthrough
CT: control target
= control target key end

     0   :  { %v607_v27 = vmov 1983009808   ;;  %v128_v29 = vlaneseq  ;;  %s948_s0 = inlined_call_operand.vmem [shape: f32[2,784], index: 0, kind: input, shape index: {}]   ;;  %s949_s1 = inlined_call_operand.vmem [shape: f32[784,10], index: 1, kind: input, shape index: {}]   ;;  %s950_s2 = inlined_call_operand.vmem [shape: f32[1,10], index: 2, kind: input, shape index: {}]   ;;  %s951_s3 = inlined_call_operand.hbm [shape: f32[2,10], index: 3, kind: output, shape index: {}]  }
   0x1   :  { %v48_v0 = vld [vmem:[%s949_s1 + $0xf8] sm:$0xff]  ;;  %v47_v2 = vld [vmem:[%s949_s1 + $0xf0] sm:$0xff]  ;;  %v46_v6 = vld [vmem:[%s949_s1 + $0xe8] sm:$0xff]  ;;  %v126_v28 = vunpack.c.l.s4 %v607_v27 }
   0x2   :  { %v32_v1 = vld [vmem:[%s949_s1 + $0x78] sm:$0xff]  ;;  %464 = vmatprep.subr.mxu0 %v48_v0  ;;  %v31_v4 = vld [vmem:[%s949_s1 + $0x70] sm:$0xff]  ;;  %v30_v8 = vld [vmem:[%s949_s1 + $0x68] sm:$0xff]  ;;  %v129_v39 = vshrl.u32 %v128_v29, 7 }
   0x3   :  { %v80_v3 = vld [vmem:[%s949_s1 + $0x1f8] sm:$0xff]  ;;  %465 = vmatpush3.msra.mxu0 %v32_v1  ;;  %v79_v7 = vld [vmem:[%s949_s1 + $0x1f0] sm:$0xff]  ;;  %v78_v10 = vld [vmem:[%s949_s1 + $0x1e8] sm:$0xff]  ;;  %v127_v38 = vunpack.c.0.s8 %v126_v28 }
   0x4   :  { %v64_v5 = vld [vmem:[%s949_s1 + $0x178] sm:$0xff]  ;;  %499 = vmatprep.subr.mxu1 %v80_v3  ;;  %466 = vmatprep.subr.mxu0 %v47_v2  ;;  %v63_v9 = vld [vmem:[%s949_s1 + $0x170] sm:$0xff]  ;;  %v45_v11 = vld [vmem:[%s949_s1 + $0xe0] sm:$0xff] }
   0x5   :  { %500 = vmatpush3.msra.mxu1 %v64_v5  ;;  %467 = vmatpush3.msra.mxu0 %v31_v4  ;;  %v62_v12 = vld [vmem:[%s949_s1 + $0x168] sm:$0xff]  ;;  %v29_v13 = vld [vmem:[%s949_s1 + $0x60] sm:$0xff]  ;;  %v44_v15 = vld [vmem:[%s949_s1 + $0xd8] sm:$0xff]  ;;  %v760_v48 = vsub.s32 %v127_v38, %v129_v39 }
   0x6   :  { %501 = vmatprep.subr.mxu1 %v79_v7  ;;  %468 = vmatprep.subr.mxu0 %v46_v6  ;;  %v77_v14 = vld [vmem:[%s949_s1 + $0x1e0] sm:$0xff]  ;;  %v28_v17 = vld [vmem:[%s949_s1 + $0x58] sm:$0xff]  ;;  %v43_v19 = vld [vmem:[%s949_s1 + $0xd0] sm:$0xff] }
   0x7   :  { %502 = vmatpush3.msra.mxu1 %v63_v9  ;;  %469 = vmatpush3.msra.mxu0 %v30_v8  ;;  %v61_v16 = vld [vmem:[%s949_s1 + $0x160] sm:$0xff]  ;;  %v76_v18 = vld [vmem:[%s949_s1 + $0x1d8] sm:$0xff]  ;;  %v27_v21 = vld [vmem:[%s949_s1 + $0x50] sm:$0xff] }
   0x8   :  { %503 = vmatprep.subr.mxu1 %v78_v10  ;;  %470 = vmatprep.subr.mxu0 %v45_v11  ;;  %v60_v20 = vld [vmem:[%s949_s1 + $0x158] sm:$0xff]  ;;  %v75_v22 = vld [vmem:[%s949_s1 + $0x1d0] sm:$0xff]  ;;  %v42_v23 = vld [vmem:[%s949_s1 + $0xc8] sm:$0xff] }
   0x9   :  { %504 = vmatpush3.msra.mxu1 %v62_v12  ;;  %471 = vmatpush3.msra.mxu0 %v29_v13  ;;  %v59_v24 = vld [vmem:[%s949_s1 + $0x150] sm:$0xff]  ;;  %v26_v25 = vld [vmem:[%s949_s1 + $0x48] sm:$0xff]  ;;  %v41_v30 = vld [vmem:[%s949_s1 + $0xc0] sm:$0xff] }
   0xa   :  { %505 = vmatprep.subr.mxu1 %v77_v14  ;;  %472 = vmatprep.subr.mxu0 %v44_v15  ;;  %v74_v26 = vld [vmem:[%s949_s1 + $0x1c8] sm:$0xff]  ;;  %v25_v32 = vld [vmem:[%s949_s1 + $0x40] sm:$0xff]  ;;  %v40_v34 = vld [vmem:[%s949_s1 + $0xb8] sm:$0xff] }
   0xb   :  { %506 = vmatpush3.msra.mxu1 %v61_v16  ;;  %473 = vmatpush3.msra.mxu0 %v28_v17  ;;  %v58_v31 = vld [vmem:[%s949_s1 + $0x148] sm:$0xff]  ;;  %v73_v33 = vld [vmem:[%s949_s1 + $0x1c0] sm:$0xff]  ;;  %v24_v36 = vld [vmem:[%s949_s1 + $0x38] sm:$0xff] }
   0xc   :  { %507 = vmatprep.subr.mxu1 %v76_v18  ;;  %474 = vmatprep.subr.mxu0 %v43_v19  ;;  %v57_v35 = vld [vmem:[%s949_s1 + $0x140] sm:$0xff]  ;;  %v72_v37 = vld [vmem:[%s949_s1 + $0x1b8] sm:$0xff]  ;;  %v39_v40 = vld [vmem:[%s949_s1 + $0xb0] sm:$0xff] }
   0xd   :  { %508 = vmatpush3.msra.mxu1 %v60_v20  ;;  %475 = vmatpush3.msra.mxu0 %v27_v21  ;;  %v56_v41 = vld [vmem:[%s949_s1 + $0x138] sm:$0xff]  ;;  %v23_v42 = vld [vmem:[%s949_s1 + $0x30] sm:$0xff]  ;;  %v38_v44 = vld [vmem:[%s949_s1 + $0xa8] sm:$0xff] }
   0xe   :  { %509 = vmatprep.subr.mxu1 %v75_v22  ;;  %476 = vmatprep.subr.mxu0 %v42_v23  ;;  %v71_v43 = vld [vmem:[%s949_s1 + $0x1b0] sm:$0xff]  ;;  %v22_v46 = vld [vmem:[%s949_s1 + $0x28] sm:$0xff]  ;;  %v37_v49 = vld [vmem:[%s949_s1 + $0xa0] sm:$0xff] }
   0xf   :  { %510 = vmatpush3.msra.mxu1 %v59_v24  ;;  %477 = vmatpush3.msra.mxu0 %v26_v25  ;;  %v55_v45 = vld [vmem:[%s949_s1 + $0x130] sm:$0xff]  ;;  %v70_v47 = vld [vmem:[%s949_s1 + $0x1a8] sm:$0xff]  ;;  %v15_v51 = vld [vmem:[%s948_s0] sm:$0xff] }
  0x10   :  { %511 = vmatprep.subr.mxu1 %v74_v26  ;;  %478 = vmatprep.subr.mxu0 %v41_v30  ;;  %v54_v50 = vld [vmem:[%s949_s1 + $0x128] sm:$0xff]  ;;  %v21_v52 = vld [vmem:[%s949_s1 + $0x20] sm:$0xff]  ;;  %v36_v54 = vld [vmem:[%s949_s1 + $0x98] sm:$0xff]  ;;  %v131_v58 = vrot.slane %v15_v51, %v760_v48  ;;  %v124_v59 = vcombine.high %v15_v51, %v15_v51 }
  0x11   :  { %512 = vmatpush3.msra.mxu1 %v58_v31  ;;  %479 = vmatpush3.msra.mxu0 %v25_v32  ;;  %v69_v53 = vld [vmem:[%s949_s1 + $0x1a0] sm:$0xff]  ;;  %v20_v56 = vld [vmem:[%s949_s1 + $0x18] sm:$0xff]  ;;  %v35_v60 = vld [vmem:[%s949_s1 + $0x90] sm:$0xff] }
  0x12   :  { %513 = vmatprep.subr.mxu1 %v73_v33  ;;  %480 = vmatprep.subr.mxu0 %v40_v34  ;;  %v53_v55 = vld [vmem:[%s949_s1 + $0x120] sm:$0xff]  ;;  %v68_v57 = vld [vmem:[%s949_s1 + $0x198] sm:$0xff]  ;;  %v19_v62 = vld [vmem:[%s949_s1 + $0x10] sm:$0xff]  ;;  %v139_v4 = vcombine.high %v131_v58, %v131_v58  ;;  %v138_v5 = vrot.slane %v124_v59, %v760_v48 }
  0x13   :  { %514 = vmatpush3.msra.mxu1 %v57_v35  ;;  %481 = vmatpush3.msra.mxu0 %v24_v36  ;;  %v52_v61 = vld [vmem:[%s949_s1 + $0x118] sm:$0xff]  ;;  %v67_v63 = vld [vmem:[%s949_s1 + $0x190] sm:$0xff]  ;;  %v34_v0 = vld [vmem:[%s949_s1 + $0x88] sm:$0xff] }
  0x14   :  { %515 = vmatprep.subr.mxu1 %v72_v37  ;;  %482 = vmatprep.subr.mxu0 %v39_v40  ;;  %v51_v1 = vld [vmem:[%s949_s1 + $0x110] sm:$0xff]  ;;  %v18_v2 = vld [vmem:[%s949_s1 + $0x8] sm:$0xff]  ;;  %v33_v6 = vld [vmem:[%s949_s1 + $0x80] sm:$0xff]  ;;  %v140_v12 = vcombine.high %v138_v5, %v138_v5 }
  0x15   :  { %516 = vmatpush3.msra.mxu1 %v56_v41  ;;  %483 = vmatpush3.msra.mxu0 %v23_v42  ;;  %v66_v3 = vld [vmem:[%s949_s1 + $0x188] sm:$0xff]  ;;  %v17_v7 = vld [vmem:[%s949_s1] sm:$0xff]  ;;  %v112_v10 = vld [vmem:[%s949_s1 + $0x2f8] sm:$0xff] }
  0x16   :  { %517 = vmatprep.subr.mxu1 %v71_v43  ;;  %484 = vmatprep.subr.mxu0 %v38_v44  ;;  %v50_v8 = vld [vmem:[%s949_s1 + $0x108] sm:$0xff]  ;;  %v65_v9 = vld [vmem:[%s949_s1 + $0x180] sm:$0xff]  ;;  %v96_v13 = vld [vmem:[%s949_s1 + $0x278] sm:$0xff] }
  0x17   :  { %518 = vmatpush3.msra.mxu1 %v55_v45  ;;  %485 = vmatpush3.msra.mxu0 %v22_v46  ;;  %v49_v11 = vld [vmem:[%s949_s1 + $0x100] sm:$0xff]  ;;  %v16_v14 = vld [vmem:[%s948_s0 + $0x8] sm:$0x3f]  ;;  %v111_v15 = vld [vmem:[%s949_s1 + $0x2f0] sm:$0xff] }
  0x18   :  { %519 = vmatprep.subr.mxu1 %v70_v47  ;;  %486 = vmatprep.subr.mxu0 %v37_v49  ;;  %v843_v16 = vrot.slane %v16_v14, %v760_v48 }
  0x19   :  { %520 = vmatpush3.msra.mxu1 %v54_v50  ;;  %487 = vmatpush3.msra.mxu0 %v21_v52 }
  0x1a   :  { %521 = vmatprep.subr.mxu1 %v69_v53  ;;  %488 = vmatprep.subr.mxu0 %v36_v54 }
  0x1b   :  { %522 = vmatpush3.msra.mxu1 %v53_v55  ;;  %489 = vmatpush3.msra.mxu0 %v20_v56 }
  0x1c   :  { %523 = vmatprep.subr.mxu1 %v68_v57  ;;  %490 = vmatprep.subr.mxu0 %v35_v60 }
  0x1d   :  { %524 = vmatpush3.msra.mxu1 %v52_v61  ;;  %491 = vmatpush3.msra.mxu0 %v19_v62 }
  0x1e   :  { %525 = vmatprep.subr.mxu1 %v67_v63  ;;  %492 = vmatprep.subr.mxu0 %v34_v0 }
  0x1f   :  { %526 = vmatpush3.msra.mxu1 %v51_v1  ;;  %493 = vmatpush3.msra.mxu0 %v18_v2 }
  0x20   :  { %527 = vmatprep.subr.mxu1 %v66_v3  ;;  %494 = vmatprep.subr.mxu0 %v33_v6 }
  0x21   :  { %230 = vmatprep.mubr.f32.mxu0 %v139_v4  ;;  %495 = vmatpush3.msra.mxu0 %v17_v7 }
  0x22   :  { %528 = vmatpush3.msra.mxu1 %v50_v8  ;;  %231 = vmatmul.mubr.f32.vlgmr.msra.gmra.mxu0 %v131_v58 }
  0x23   :  { %529 = vmatprep.subr.mxu1 %v65_v9 }
  0x24   :  { %8 = vsyncpa [#allocation3], 0  ;;  %534 = vmatprep.subr.mxu0 %v112_v10  ;;  %530 = vmatpush3.msra.mxu1 %v49_v11  ;;  %v95_v17 = vld [vmem:[%s949_s1 + $0x270] sm:$0xff]  ;;  %v110_v18 = vld [vmem:[%s949_s1 + $0x2e8] sm:$0xff]  ;;  %v141_v19 = vcombine.high %v16_v14, %v16_v14  ;;  %v156_v20 = vcombine.high %v843_v16, %v843_v16  ;;  %v608_v25 = vmov 0.0   ;;  %vm163_vm0 = vcmask 130048  }
  0x25   :  { %300 = vmatprep.mubr.f32.mxu1 %v140_v12  ;;  %535 = vmatpush3.msra.mxu0 %v96_v13  ;;  %v94_v21 = vld [vmem:[%s949_s1 + $0x268] sm:$0xff]  ;;  %v109_v23 = vld [vmem:[%s949_s1 + $0x2e0] sm:$0xff]  ;;  %v108_v27 = vld [vmem:[%s949_s1 + $0x2d8] sm:$0xff]  ;;  %vm609_vm1 = vmmov 0   ;;  %vm446_vm2 = vcmask 74752  }
  0x26   :  { %301 = vmatmul.mubr.f32.vlgmr.msra.gmra.mxu1 %v138_v5  ;;  %536 = vmatprep.subr.mxu0 %v111_v15  ;;  %v114_v22 = vld [vmem:[%s949_s1 + $0x308] sm:$0xff]  ;;  %v93_v24 = vld [vmem:[%s949_s1 + $0x260] sm:$0xff]  ;;  %v155_v28 = vrot.slane %v141_v19, %v760_v48  ;;  %v92_v29 = vld [vmem:[%s949_s1 + $0x258] sm:$0xff] }
  0x27   :  { %537 = vmatpush3.msra.mxu0 %v95_v17  ;;  %370 = vmatprep.mubr.f32.mxu0 %v156_v20  ;;  %v113_v26 = vld [vmem:[%s949_s1 + $0x300] sm:$0xff]  ;;  %v107_v30 = vld [vmem:[%s949_s1 + $0x2d0] sm:$0xff]  ;;  %v106_v32 = vld [vmem:[%s949_s1 + $0x2c8] sm:$0xff] }
  0x28   :  { %538 = vmatprep.subr.mxu0 %v110_v18  ;;  %572 = vmatprep.subr.mxu1 %v608_v25  ;;  %v91_v31 = vld [vmem:[%s949_s1 + $0x250] sm:$0xff]  ;;  %v90_v33 = vld [vmem:[%s949_s1 + $0x248] sm:$0xff]  ;;  %v105_v34 = vld [vmem:[%s949_s1 + $0x2c0] sm:$0xff] }
  0x29   :  { %539 = vmatpush3.msra.mxu0 %v94_v21  ;;  %573 = vmatpush3.msra.mxu1 %v114_v22  ;;  %v89_v35 = vld [vmem:[%s949_s1 + $0x240] sm:$0xff]  ;;  %v104_v36 = vld [vmem:[%s949_s1 + $0x2b8] sm:$0xff]  ;;  %v103_v38 = vld [vmem:[%s949_s1 + $0x2b0] sm:$0xff] }
  0x2a   :  { %540 = vmatprep.subr.mxu0 %v109_v23  ;;  %574 = vmatprep.subr.mxu1 %v608_v25  ;;  %v88_v37 = vld [vmem:[%s949_s1 + $0x238] sm:$0xff]  ;;  %v87_v39 = vld [vmem:[%s949_s1 + $0x230] sm:$0xff]  ;;  %v102_v40 = vld [vmem:[%s949_s1 + $0x2a8] sm:$0xff] }
  0x2b   :  { %541 = vmatpush3.msra.mxu0 %v93_v24  ;;  %575 = vmatpush3.msra.mxu1 %v113_v26  ;;  %v86_v41 = vld [vmem:[%s949_s1 + $0x228] sm:$0xff]  ;;  %v101_v42 = vld [vmem:[%s949_s1 + $0x2a0] sm:$0xff]  ;;  %v100_v44 = vld [vmem:[%s949_s1 + $0x298] sm:$0xff] }
  0x2c   :  { %542 = vmatprep.subr.mxu0 %v108_v27  ;;  %576 = vmatprep.mubr.msk.f32.mxu1 %vm609_vm1, %v608_v25  ;;  %v85_v43 = vld [vmem:[%s949_s1 + $0x220] sm:$0xff]  ;;  %v84_v45 = vld [vmem:[%s949_s1 + $0x218] sm:$0xff]  ;;  %v99_v46 = vld [vmem:[%s949_s1 + $0x290] sm:$0xff] }
  0x2d   :  { %543 = vmatpush3.msra.mxu0 %v92_v29  ;;  %577 = vmatmul.mubr.msk.f32.vlgmr.msra.gmra.mxu1 %vm163_vm0, %v155_v28  ;;  %v83_v47 = vld [vmem:[%s949_s1 + $0x210] sm:$0xff]  ;;  %v98_v48 = vld [vmem:[%s949_s1 + $0x288] sm:$0xff]  ;;  %v97_v50 = vld [vmem:[%s949_s1 + $0x280] sm:$0xff] }
  0x2e   :  { %544 = vmatprep.subr.mxu0 %v107_v30  ;;  %v82_v49 = vld [vmem:[%s949_s1 + $0x208] sm:$0xff]  ;;  %v81_v51 = vld [vmem:[%s949_s1 + $0x200] sm:$0xff]  ;;  %s610_s1 = smov [#allocation2]  }
  0x2f   :  { %545 = vmatpush3.msra.mxu0 %v91_v31  ;;  %v462_v59 = vld [vmem:[%s950_s2] ss:$0 sm:$0xff]  ;;  %s454_s22 = sshll.u32 %s610_s1, 4  ;;  %s455_s22 = int_to_ptr.vmem [resolvable:$true] %s454_s22 }
  0x30   :  { %546 = vmatprep.subr.mxu0 %v106_v32  ;;  %s585_s23 = scalar_lea.vmem %s455_s22, 32  ;;  %p590_p1 = scmp.lt.s32.totalorder %s455_s22, %s455_s22 }
  0x31   :  { %547 = vmatpush3.msra.mxu0 %v90_v33  ;;  %p586_p0 = scmp.ne.s32.totalorder %s455_s22, %s585_s23  ;;  %p591_p2 = scmp.lt.s32.totalorder %s585_s23, %s585_s23 }
  0x32   :  { %548 = vmatprep.subr.mxu0 %v105_v34 }
  0x33   :  { %549 = vmatpush3.msra.mxu0 %v89_v35  ;;  %p592_p3 = por %p591_p2, %p590_p1 }
  0x34   :  { %550 = vmatprep.subr.mxu0 %v104_v36 }
  0x35   :  { %551 = vmatpush3.msra.mxu0 %v88_v37  ;;  %p593_p4 = pnand %p592_p3, %p586_p0 }
  0x36   :  { %552 = vmatprep.subr.mxu0 %v103_v38 }
  0x37   :  { %553 = vmatpush3.msra.mxu0 %v87_v39 }
  0x38   :  { %554 = vmatprep.subr.mxu0 %v102_v40 }
  0x39   :  { %555 = vmatpush3.msra.mxu0 %v86_v41 }
  0x3a   :  { %556 = vmatprep.subr.mxu0 %v101_v42 }
  0x3b   :  { %557 = vmatpush3.msra.mxu0 %v85_v43 }
  0x3c   :  { %558 = vmatprep.subr.mxu0 %v100_v44 }
  0x3d   :  { %559 = vmatpush3.msra.mxu0 %v84_v45 }
  0x3e   :  { %560 = vmatprep.subr.mxu0 %v99_v46 }
  0x3f   :  { %561 = vmatpush3.msra.mxu0 %v83_v47 }
  0x40   :  { %562 = vmatprep.subr.mxu0 %v98_v48 }
  0x41   :  { %563 = vmatpush3.msra.mxu0 %v82_v49 }
  0x42   :  { %564 = vmatprep.subr.mxu0 %v97_v50 }
  0x43   :  { %565 = vmatpush3.msra.mxu0 %v81_v51 }
  0x44   :  { %371 = vmatmul.mubr.f32.vlgmr.msra.gmra.mxu0 %v843_v16 }
  0xe2   :  { %v496_v56 = vpop.f32.mrf.mxu0 }
  0xe4   :  { %v497_v57 = vpop.f32.mrf.mxu0 }
  0xe5   :  { %v498_v58 = vadd.f32 %v497_v57, %v496_v56 }
  0xe6   :  { %v531_v52 = vpop.f32.mrf.mxu1 }
  0xe7   :  { %v233_v60 = vadd.f32 %v498_v58, %v462_v59 }
  0xe8   :  { %v532_v53 = vpop.f32.mrf.mxu1 }
  0xe9   :  { %v533_v61 = vadd.f32 %v532_v53, %v531_v52 }
  0xeb   :  { %v303_v0 = vadd.f32 %v533_v61, %v233_v60 }
  0xed   :  { %v442_v54 = vpop.f32.mrf.mxu1 }
  0xef   :  { %v578_v55 = vpop.f32.mrf.mxu1 }
 0x104   :  { %v566_v62 = vpop.f32.mrf.mxu0 }
 0x106   :  { %v567_v63 = vpop.f32.mrf.mxu0 }
 0x107   :  { %v568_v1 = vadd.f32 %v567_v63, %v566_v62 }
 0x109   :  { %v373_v2 = vadd.f32 %v568_v1, %v303_v0 }
 0x10b   :  { %v443_v3 = vadd.f32 %v442_v54, %v373_v2 }
 0x10d   :  { %447 = vst.msk [vmem:[#allocation2] sm:$0x3] %vm446_vm2, %v443_v3 }
 0x10e   :  { %596 = shalt.err (!%p593_p4)
}
 0x10f   :  { %457 = dma.vmem_to_hbm [thread:$0]  %s455_s22, 32, %s951_s3, [#allocation3]  }
 0x110   :  { %605 = dma.done.wait [#allocation3], 32  }
 0x111   :  { %606 = vsyncadd [#allocation3], 4294967264 }
 0x112   :  { %461 = vsyncpa [#allocation3], 1 }

</bundles_post_ra>
